<compile_context>
chip_gen: v6e
topology: v6e:2x2x1
jax: 0.10.0
libtpu: 0.0.40
codegen_flags: <defaults>
</compile_context>

<pallas_src>
import functools

import jax
import jax.numpy as jnp
from jax.experimental import pallas as pl
from jax.experimental.pallas import tpu as pltpu

NEG_SLOPE = -0.25237051


def _round_up(x, m):
    return ((x + m - 1) // m) * m


def _fused_kernel(x_ref, w_ref, b_ref, o_ref, acc_ref, *, kw, ow, kwc_pad):
    # grid = (N, OH, KH); axis 2 (kh) is the reduction axis
    k = pl.program_id(2)

    @pl.when(k == 0)
    def _():
        acc_ref[...] = jnp.zeros_like(acc_ref)

    # one NHWC input row at height oh + kh, shape (W, C), bf16
    row = x_ref[0, 0]
    c = row.shape[1]

    # implicit im2col for this kh: slab[i, j*C + cc] = row[i + j, cc]
    pieces = [row[j:j + ow, :] for j in range(kw)]
    pad = kwc_pad - kw * c
    if pad:
        pieces.append(jnp.zeros((ow, pad), dtype=row.dtype))
    slab = jnp.concatenate(pieces, axis=1)            # (OW, KWC_pad) bf16

    # folded conv as a GEMM on the MXU (bf16 operands, f32 accumulate)
    acc_ref[...] += jnp.dot(slab, w_ref[k], preferred_element_type=jnp.float32)

    @pl.when(k == pl.num_programs(2) - 1)
    def _():
        v = acc_ref[...] + b_ref[...]
        # torch.where(v2 > 0, v2, v2 * negative_slope)
        o_ref[0, 0] = jnp.where(v > 0.0, v, v * NEG_SLOPE).astype(o_ref.dtype)


def prepare_params(w0, b0, w1, b1):
    """One-time weight transform (outside the per-call path):
    fold conv1 into conv0 in f32, reshape to the implicit-GEMM layout
    (KH, pad128(KW*C), pad128(O1)), cast once to bf16."""
    O0, C, KH, KW = w0.shape                  # (80, 33, 23, 23)
    O1 = w1.shape[0]                          # 56
    w1m = w1.reshape(O1, O0).astype(jnp.float32)
    # fold in f32, cast once at the end (avoids double rounding)
    wf = jnp.einsum("ab,bckl->ackl", w1m, w0.astype(jnp.float32))  # (O1,C,KH,KW)
    bf = w1m @ b0.astype(jnp.float32) + b1.astype(jnp.float32)     # (O1,)

    KWC = KW * C
    KWC_pad = _round_up(KWC, 128)             # 759 -> 768
    O1p = _round_up(O1, 128)                  # 56  -> 128 (lane-dense output)

    # column order (kw, c) matches the in-kernel slab construction
    wfm = wf.transpose(2, 3, 1, 0).reshape(KH, KWC, O1)
    wfm = jnp.pad(wfm, ((0, 0), (0, KWC_pad - KWC), (0, O1p - O1)))
    wfm = wfm.astype(jnp.bfloat16)
    bfm = jnp.pad(bf.reshape(1, O1), ((0, 0), (0, O1p - O1))).astype(jnp.float32)
    return wfm, bfm, KH, KW, O1


@functools.partial(jax.jit, static_argnames=("kh", "kw", "o1"))
def fused_forward(x, wfm, bfm, *, kh, kw, o1):
    N, C, H, W = x.shape
    OH, OW = H - kh + 1, W - kw + 1
    KH, KWC_pad, O1p = wfm.shape

    # single cheap layout pass: NCHW f32 -> NHWC bf16 (no im2col in HBM)
    xn = x.astype(jnp.bfloat16).transpose(0, 2, 3, 1)      # (N, H, W, C)

    kernel = functools.partial(_fused_kernel, kw=kw, ow=OW, kwc_pad=KWC_pad)

    out = pl.pallas_call(
        kernel,
        out_shape=jax.ShapeDtypeStruct((N, OH, OW, O1p), jnp.float32),
        grid_spec=pltpu.PrefetchScalarGridSpec(
            num_scalar_prefetch=0,
            grid=(N, OH, KH),
            in_specs=[
                # one input row (height oh + kh) per step; block covers the
                # full (W, C) extents so the (8,128) rule is satisfied
                pl.BlockSpec((1, 1, W, C), lambda n, oh, k: (n, oh + k, 0, 0)),
                # folded weight: constant index map -> stays VMEM-resident
                pl.BlockSpec((KH, KWC_pad, O1p), lambda n, oh, k: (0, 0, 0)),
                pl.BlockSpec((1, O1p), lambda n, oh, k: (0, 0)),
            ],
            out_specs=pl.BlockSpec((1, 1, OW, O1p),
                                   lambda n, oh, k: (n, oh, 0, 0)),
            scratch_shapes=[pltpu.VMEM((OW, O1p), jnp.float32)],
        ),
        compiler_params=pltpu.CompilerParams(
            dimension_semantics=("parallel", "parallel", "arbitrary"),
            vmem_limit_bytes=48 << 20,        # <= v7x's 64 MiB physical VMEM
        ),
    )(xn, wfm, bfm)

    # strip channel padding, back to NCHW
    return out[..., :o1].transpose(0, 3, 1, 2)


def reference_forward(x, w0, b0, w1, b1):
    dn = ("NCHW", "OIHW", "NCHW")
    v1 = jax.lax.conv_general_dilated(x, w0, (1, 1), "VALID",
                                      dimension_numbers=dn)
    v1 = v1 + b0[None, :, None, None]
    v2 = jax.lax.conv_general_dilated(v1, w1, (1, 1), "VALID",
                                      dimension_numbers=dn)
    v2 = v2 + b1[None, :, None, None]
    return jnp.where(v2 > 0, v2, v2 * NEG_SLOPE)


if __name__ == "__main__":
    key = jax.random.PRNGKey(0)
    kx, k0, kb0, k1, kb1 = jax.random.split(key, 5)

    # SMALL shapes consistent with the module: C_in=33, spatial >= kernel (23)
    N, C, H, W = 2, 33, 26, 26            # -> conv0 output spatial 4x4
    x = jax.random.normal(kx, (N, C, H, W), jnp.float32)

    # deterministic synthetic parameters (shapes from the module __init__)
    w0 = 0.02 * jax.random.normal(k0, (80, 33, 23, 23), jnp.float32)
    b0 = 0.10 * jax.random.normal(kb0, (80,), jnp.float32)
    w1 = 0.05 * jax.random.normal(k1, (56, 80, 1, 1), jnp.float32)
    b1 = 0.10 * jax.random.normal(kb1, (56,), jnp.float32)

    # one-time weight fold + layout transform (not in the per-call path)
    wfm, bfm, KH, KW, O1 = prepare_params(w0, b0, w1, b1)

    y = fused_forward(x, wfm, bfm, kh=KH, kw=KW, o1=O1)
    y = jax.block_until_ready(y)

    y_ref = reference_forward(x, w0, b0, w1, b1)
    assert y.shape == (N, 56, H - 22, W - 22), y.shape
    assert jnp.allclose(y, y_ref, rtol=1e-1, atol=1e-1), "mismatch vs reference"

    print("KERNEL_OK")
</pallas_src>

<mosaic_0001>
module attributes {stable_mosaic.version = 11 : i64} {
  func.func @_fused_kernel(%arg0: i32, %arg1: i32, %arg2: i32, %arg3: memref<1x1x26x33xbf16, #tpu.memory_space<vmem>>, %arg4: memref<23x768x128xbf16, #tpu.memory_space<vmem>>, %arg5: memref<1x128xf32, #tpu.memory_space<vmem>>, %arg6: memref<1x1x4x128xf32, #tpu.memory_space<vmem>>, %arg7: memref<4x128xf32, #tpu.memory_space<vmem>>) attributes {dimension_semantics = [#tpu.dimension_semantics<parallel>, #tpu.dimension_semantics<parallel>, #tpu.dimension_semantics<arbitrary>], iteration_bounds = array<i64: 2, 4, 23>, scalar_prefetch = 0 : i64, scratch_operands = 1 : i64, tpu.core_type = #tpu.core_type<tc>, window_params = [{transform_indices = @transform_0, window_bounds = array<i64: 1, 1, 26, 33>}, {pipeline_mode = #tpu.pipeline_mode<synchronous>, transform_indices = @transform_1, window_bounds = array<i64: 23, 768, 128>}, {pipeline_mode = #tpu.pipeline_mode<synchronous>, transform_indices = @transform_2, window_bounds = array<i64: 1, 128>}, {transform_indices = @transform_3, window_bounds = array<i64: 1, 1, 4, 128>}]} {
    %c0_i32 = arith.constant 0 : i32
    %0 = arith.cmpi eq, %arg2, %c0_i32 : i32
    %1 = arith.extui %0 : i1 to i32
    %c0_i32_0 = arith.constant 0 : i32
    %2 = arith.cmpi ne, %1, %c0_i32_0 : i32
    scf.if %2 {
      %cst_12 = arith.constant 0.000000e+00 : f32
      %42 = vector.broadcast %cst_12 : f32 to vector<4x128xf32>
      %c0_13 = arith.constant 0 : index
      %c0_14 = arith.constant 0 : index
      %43 = vector.load %arg7[%c0_13, %c0_14] : memref<4x128xf32, #tpu.memory_space<vmem>>, vector<4x128xf32>
      tpu.vector_store %arg7[%c0_13, %c0_14], %42 {strides = array<i32>} : memref<4x128xf32, #tpu.memory_space<vmem>>, vector<4x128xf32>,
    } else {
    }
    %c0 = arith.constant 0 : index
    %c0_1 = arith.constant 0 : index
    %c0_2 = arith.constant 0 : index
    %c0_3 = arith.constant 0 : index
    %3 = vector.load %arg3[%c0, %c0_1, %c0_2, %c0_3] : memref<1x1x26x33xbf16, #tpu.memory_space<vmem>>, vector<1x1x26x33xbf16>
    %4 = vector.shape_cast %3 : vector<1x1x26x33xbf16> to vector<26x33xbf16>
    %5 = vector.extract_strided_slice %4 {offsets = [0, 0], sizes = [4, 33], strides = [1, 1]} : vector<26x33xbf16> to vector<4x33xbf16>
    %6 = vector.extract_strided_slice %4 {offsets = [1, 0], sizes = [4, 33], strides = [1, 1]} : vector<26x33xbf16> to vector<4x33xbf16>
    %7 = vector.extract_strided_slice %4 {offsets = [2, 0], sizes = [4, 33], strides = [1, 1]} : vector<26x33xbf16> to vector<4x33xbf16>
    %8 = vector.extract_strided_slice %4 {offsets = [3, 0], sizes = [4, 33], strides = [1, 1]} : vector<26x33xbf16> to vector<4x33xbf16>
    %9 = vector.extract_strided_slice %4 {offsets = [4, 0], sizes = [4, 33], strides = [1, 1]} : vector<26x33xbf16> to vector<4x33xbf16>
    %10 = vector.extract_strided_slice %4 {offsets = [5, 0], sizes = [4, 33], strides = [1, 1]} : vector<26x33xbf16> to vector<4x33xbf16>
    %11 = vector.extract_strided_slice %4 {offsets = [6, 0], sizes = [4, 33], strides = [1, 1]} : vector<26x33xbf16> to vector<4x33xbf16>
    %12 = vector.extract_strided_slice %4 {offsets = [7, 0], sizes = [4, 33], strides = [1, 1]} : vector<26x33xbf16> to vector<4x33xbf16>
    %13 = vector.extract_strided_slice %4 {offsets = [8, 0], sizes = [4, 33], strides = [1, 1]} : vector<26x33xbf16> to vector<4x33xbf16>
    %14 = vector.extract_strided_slice %4 {offsets = [9, 0], sizes = [4, 33], strides = [1, 1]} : vector<26x33xbf16> to vector<4x33xbf16>
    %15 = vector.extract_strided_slice %4 {offsets = [10, 0], sizes = [4, 33], strides = [1, 1]} : vector<26x33xbf16> to vector<4x33xbf16>
    %16 = vector.extract_strided_slice %4 {offsets = [11, 0], sizes = [4, 33], strides = [1, 1]} : vector<26x33xbf16> to vector<4x33xbf16>
    %17 = vector.extract_strided_slice %4 {offsets = [12, 0], sizes = [4, 33], strides = [1, 1]} : vector<26x33xbf16> to vector<4x33xbf16>
    %18 = vector.extract_strided_slice %4 {offsets = [13, 0], sizes = [4, 33], strides = [1, 1]} : vector<26x33xbf16> to vector<4x33xbf16>
    %19 = vector.extract_strided_slice %4 {offsets = [14, 0], sizes = [4, 33], strides = [1, 1]} : vector<26x33xbf16> to vector<4x33xbf16>
    %20 = vector.extract_strided_slice %4 {offsets = [15, 0], sizes = [4, 33], strides = [1, 1]} : vector<26x33xbf16> to vector<4x33xbf16>
    %21 = vector.extract_strided_slice %4 {offsets = [16, 0], sizes = [4, 33], strides = [1, 1]} : vector<26x33xbf16> to vector<4x33xbf16>
    %22 = vector.extract_strided_slice %4 {offsets = [17, 0], sizes = [4, 33], strides = [1, 1]} : vector<26x33xbf16> to vector<4x33xbf16>
    %23 = vector.extract_strided_slice %4 {offsets = [18, 0], sizes = [4, 33], strides = [1, 1]} : vector<26x33xbf16> to vector<4x33xbf16>
    %24 = vector.extract_strided_slice %4 {offsets = [19, 0], sizes = [4, 33], strides = [1, 1]} : vector<26x33xbf16> to vector<4x33xbf16>
    %25 = vector.extract_strided_slice %4 {offsets = [20, 0], sizes = [4, 33], strides = [1, 1]} : vector<26x33xbf16> to vector<4x33xbf16>
    %26 = vector.extract_strided_slice %4 {offsets = [21, 0], sizes = [4, 33], strides = [1, 1]} : vector<26x33xbf16> to vector<4x33xbf16>
    %27 = vector.extract_strided_slice %4 {offsets = [22, 0], sizes = [4, 33], strides = [1, 1]} : vector<26x33xbf16> to vector<4x33xbf16>
    %cst = arith.constant 0.000000e+00 : bf16
    %28 = vector.broadcast %cst : bf16 to vector<4x9xbf16>
    %29 = tpu.concatenate %5, %6, %7, %8, %9, %10, %11, %12, %13, %14, %15, %16, %17, %18, %19, %20 in 1 : vector<4x33xbf16>, vector<4x33xbf16>, vector<4x33xbf16>, vector<4x33xbf16>, vector<4x33xbf16>, vector<4x33xbf16>, vector<4x33xbf16>, vector<4x33xbf16>, vector<4x33xbf16>, vector<4x33xbf16>, vector<4x33xbf16>, vector<4x33xbf16>, vector<4x33xbf16>, vector<4x33xbf16>, vector<4x33xbf16>, vector<4x33xbf16> -> vector<4x528xbf16>
    %30 = tpu.concatenate %21, %22, %23, %24, %25, %26, %27, %28 in 1 : vector<4x33xbf16>, vector<4x33xbf16>, vector<4x33xbf16>, vector<4x33xbf16>, vector<4x33xbf16>, vector<4x33xbf16>, vector<4x33xbf16>, vector<4x9xbf16> -> vector<4x240xbf16>
    %31 = tpu.concatenate %29, %30 in 1 : vector<4x528xbf16>, vector<4x240xbf16> -> vector<4x768xbf16>
    %c0_4 = arith.constant 0 : index
    %c0_5 = arith.constant 0 : index
    %32 = vector.load %arg7[%c0_4, %c0_5] : memref<4x128xf32, #tpu.memory_space<vmem>>, vector<4x128xf32>
    %33 = arith.index_cast %arg2 : i32 to index
    %c0_6 = arith.constant 0 : index
    %c0_7 = arith.constant 0 : index
    %34 = vector.load %arg4[%33, %c0_6, %c0_7] : memref<23x768x128xbf16, #tpu.memory_space<vmem>>, vector<1x768x128xbf16>
    %35 = vector.shape_cast %34 : vector<1x768x128xbf16> to vector<768x128xbf16>
    %cst_8 = arith.constant dense<0.000000e+00> : vector<4x128xf32>
    %36 = tpu.matmul %31, %35, %cst_8 {dimension_numbers = #tpu.dot_dimension_numbers<[1], [0], [0], [1], [0, 0, 1, 1], [], []>} : vector<4x768xbf16>, vector<768x128xbf16>, vector<4x128xf32> -> vector<4x128xf32>
    %37 = arith.addf %32, %36 : vector<4x128xf32>
    %c0_9 = arith.constant 0 : index
    %c0_10 = arith.constant 0 : index
    %38 = vector.load %arg7[%c0_9, %c0_10] : memref<4x128xf32, #tpu.memory_space<vmem>>, vector<4x128xf32>
    tpu.vector_store %arg7[%c0_9, %c0_10], %37 {strides = array<i32>} : memref<4x128xf32, #tpu.memory_space<vmem>>, vector<4x128xf32>,
    %c22_i32 = arith.constant 22 : i32
    %39 = arith.cmpi eq, %arg2, %c22_i32 : i32
    %40 = arith.extui %39 : i1 to i32
    %c0_i32_11 = arith.constant 0 : i32
    %41 = arith.cmpi ne, %40, %c0_i32_11 : i32
    scf.if %41 {
      %c0_12 = arith.constant 0 : index
      %c0_13 = arith.constant 0 : index
      %42 = vector.load %arg7[%c0_12, %c0_13] : memref<4x128xf32, #tpu.memory_space<vmem>>, vector<4x128xf32>
      %c0_14 = arith.constant 0 : index
      %c0_15 = arith.constant 0 : index
      %43 = vector.load %arg5[%c0_14, %c0_15] : memref<1x128xf32, #tpu.memory_space<vmem>>, vector<1x128xf32>
      %44 = vector.broadcast %43 : vector<1x128xf32> to vector<4x128xf32>
      %45 = arith.addf %42, %44 : vector<4x128xf32>
      %cst_16 = arith.constant 0.000000e+00 : f32
      %46 = vector.broadcast %cst_16 : f32 to vector<4x128xf32>
      %47 = arith.cmpf ogt, %45, %46 : vector<4x128xf32>
      %cst_17 = arith.constant -0.252370507 : f32
      %48 = vector.broadcast %cst_17 : f32 to vector<4x128xf32>
      %49 = arith.mulf %45, %48 : vector<4x128xf32>
      %50 = arith.select %47, %45, %49 : vector<4x128xi1>, vector<4x128xf32>
      %c0_18 = arith.constant 0 : index
      %c0_19 = arith.constant 0 : index
      %c0_20 = arith.constant 0 : index
      %c0_21 = arith.constant 0 : index
      %51 = vector.load %arg6[%c0_18, %c0_19, %c0_20, %c0_21] : memref<1x1x4x128xf32, #tpu.memory_space<vmem>>, vector<1x1x4x128xf32>
      %52 = vector.shape_cast %51 : vector<1x1x4x128xf32> to vector<4x128xf32>
      %53 = vector.shape_cast %50 : vector<4x128xf32> to vector<1x1x4x128xf32>
      tpu.vector_store %arg6[%c0_18, %c0_19, %c0_20, %c0_21], %53 {strides = array<i32>} : memref<1x1x4x128xf32, #tpu.memory_space<vmem>>, vector<1x1x4x128xf32>,
    } else {
    }
    return
  }
  func.func @transform_0(%arg0: i32, %arg1: i32, %arg2: i32) -> (i32, i32, i32, i32) {
    %0 = arith.addi %arg1, %arg2 : i32
    %c0_i32 = arith.constant 0 : i32
    %c0_i32_0 = arith.constant 0 : i32
    %c0_i32_1 = arith.constant 0 : i32
    return %arg0, %0, %c0_i32, %c0_i32_0 : i32, i32, i32, i32
  }
  func.func @transform_1(%arg0: i32, %arg1: i32, %arg2: i32) -> (i32, i32, i32) {
    %c0_i32 = arith.constant 0 : i32
    %c0_i32_0 = arith.constant 0 : i32
    %c0_i32_1 = arith.constant 0 : i32
    %c0_i32_2 = arith.constant 0 : i32
    return %c0_i32, %c0_i32_0, %c0_i32_1 : i32, i32, i32
  }
  func.func @transform_2(%arg0: i32, %arg1: i32, %arg2: i32) -> (i32, i32) {
    %c0_i32 = arith.constant 0 : i32
    %c0_i32_0 = arith.constant 0 : i32
    %c0_i32_1 = arith.constant 0 : i32
    return %c0_i32, %c0_i32_0 : i32, i32
  }
  func.func @transform_3(%arg0: i32, %arg1: i32, %arg2: i32) -> (i32, i32, i32, i32) {
    %c0_i32 = arith.constant 0 : i32
    %c0_i32_0 = arith.constant 0 : i32
    %c0_i32_1 = arith.constant 0 : i32
    return %arg0, %arg1, %c0_i32, %c0_i32_0 : i32, i32, i32, i32
  }
}

</mosaic_0001>

<bundles_post_ra>
// kernel: fused_forward.1
= control target key start
LH: loop header
LB: loop body
LE: loop exit
PB: predicated region body
PF: predicated region fallthrough
CT: control target
= control target key end

     0   :  { %8 = vsyncpa [#allocation4], 0  ;;  %s1795_s0 = inlined_call_operand.vmem [shape: bf16[2,26,26,33], index: 0, kind: input, shape index: {}]   ;;  %s1796_s1 = inlined_call_operand.hbm [shape: bf16[23,768,128], index: 1, kind: input, shape index: {}]   ;;  %s1797_s2 = inlined_call_operand.hbm [shape: f32[1,128], index: 2, kind: input, shape index: {}]   ;;  %s1798_s3 = inlined_call_operand.vmem [shape: f32[2,4,4,128], index: 3, kind: output, shape index: {}]  }
   0x1   :  { %9 = vsyncpa [#allocation6], 0  ;;  %s1555_s12 = smov 0   ;;  %s1557_s13 = smov 0  }
   0x2   :  { %s1559_s14 = smov 0   ;;  %s1561_s15 = smov 0  }
   0x3   :  { %s1563_s16 = smov 0   ;;  %s1565_s17 = smov 0  }
   0x4   :  { %s1567_s18 = smov 0  }
   0x5 LB: > { %s1107_s19 = sadd.s32 4294967295, %s1512_s18   ;;  %s27_s20 = sadd.s32 1, %s1500_s15  ;;  %s1512_s18 = sphi %s1567_s18, %s15_s18   ;;  %s1508_s17 = sphi %s1565_s17, %s1807_s17   ;;  %s1504_s16 = sphi %s1563_s16, %s1806_s16   ;;  %s1500_s15 = sphi %s1561_s15, %s1805_s15   ;;  %s1496_s14 = sphi %s1559_s14, %s1804_s14   ;;  %s1492_s13 = sphi %s1557_s13, %s1803_s13   ;;  %s1488_s12 = sphi %s1555_s12, %s1802_s12  }
   0x6   : > { %p28_p0 = scmp.ge.s32.totalorder %s27_s20, 23  ;;  %s30_s21 = sadd.s32 1, %s1504_s16 }
   0x7   : > { %s34_s22 = sadd.s32 1, %s1508_s17  ;;  %p1109_p1 = scmp.ge.s32.totalorder %s1512_s18, 1 }
   0x8   : > { %s1809_s20 = smov (%p28_p0, %s27_s20), 0  ;;  %s1811_s21 = smov (!%p28_p0, %s30_s21), %s1504_s16 }
   0x9   : > { %p139_p2 = scmp.lt.s32.totalorder %s1512_s18, 185  ;;  %p32_p3 = scmp.ge.s32.totalorder %s1811_s21, 4 }
   0xa   : > { %p1599_p4 = scmp.eq.s32.totalorder %s1107_s19, 0  ;;  %s1514_s25 = smov [#allocation3]  }
   0xb   : > { %p1603_p5 = pnand %p1109_p1, %p139_p2  ;;  %s1813_s21 = smov (%p32_p3, %s1811_s21), 0 }
   0xc   : > { %s1815_s22 = smov (!%p32_p3, %s34_s22), %s1508_s17  ;;  %s151_s26 = sshll.u32 %s1514_s25, 4  ;;  %s152_s26 = int_to_ptr.vmem [resolvable:$true] %s151_s26 }
   0xd   : > { %p1256_p6 = pneg %p1603_p5  ;;  %p36_p7 = scmp.ge.s32.totalorder %s1815_s22, 2 }
   0xe   : > { %s1409_s28 = scalar_lea.vmem %s152_s26, 141312  ;;  %p1417_p13 = scmp.lt.s32.totalorder %s152_s26, %s152_s26 }
   0xf   : > { %p1614_p8 = pnand %p1599_p4, %p1256_p6  ;;  %s1817_s22 = smov (%p36_p7, %s1815_s22), 0 }
  0x10   : > { %p1410_p10 = scmp.ne.s32.totalorder %s152_s26, %s1409_s28  ;;  %p1418_p0 = scmp.lt.s32.totalorder %s1409_s28, %s1409_s28 }
  0x11   : > { %p1400_p9 = pneg %p1614_p8 }
  0x12   : > { %p1419_p1 = por %p1418_p0, %p1417_p13 }
  0x13   : > { %p1412_p11 = pnand %p1410_p10, %p1400_p9 }
  0x15   : > { %p1413_p12 = pneg %p1412_p11 }
  0x17   : > { %p1420_p2 = pnand %p1419_p1, %p1413_p12 }
  0x19   : > { %1423 = shalt.err (!%p1420_p2)
}
  0x1a   : > { %s1515_s29 = smov 64   ;;  %s1516_s30 = smov 4  }
  0x1b   : > { %1259 = dma.hbm_to_vmem [thread:$0]  (!%p1614_p8), %s1796_s1, 141312, %s152_s26, [#allocation4], %s1515_s29, %s1515_s29, %s1516_s30  }
  0x1c   : > { %s1517_s6 = smov [#allocation5]  }
  0x1d   : > { %s165_s7 = sshll.u32 %s1517_s6, 4  ;;  %s166_s7 = int_to_ptr.vmem [resolvable:$true] %s165_s7 }
  0x1e   : > { %s1435_s8 = scalar_lea.vmem %s166_s7, 16  ;;  %s1442_s9 = scalar_lea.vmem %s166_s7, 32 }
  0x1f   : > { %p1436_p3 = scmp.ne.s32.totalorder %s166_s7, %s1435_s8  ;;  %p1443_p10 = scmp.lt.s32.totalorder %s166_s7, %s166_s7 }
  0x20   : > { %p1444_p11 = scmp.lt.s32.totalorder %s1442_s9, %s1435_s8 }
  0x21   : > { %p1438_p6 = pnand %p1436_p3, %p1400_p9 }
  0x22   : > { %p1445_p12 = por %p1444_p11, %p1443_p10 }
  0x23   : > { %p1439_p7 = pneg %p1438_p6 }
  0x25   : > { %p1446_p13 = pnand %p1445_p12, %p1439_p7 }
  0x27   : > { %1449 = shalt.err (!%p1446_p13)
}
  0x28   : > { %1262 = dma.hbm_to_vmem [thread:$0]  (!%p1614_p8), %s1797_s2, 16, %s166_s7, [#allocation6]  }
  0x29   : > { %192 = sbr.rel (%p1603_p5) target bundleno = 530 (0x212), region = 32 }
  0x2e   : > { %1479 = dma.done.wait (%p1599_p4), [#allocation4], 141312  }
  0x2f   : > { %1481 = vsyncadd (%p1599_p4), [#allocation4], 4294825984 }
  0x30   : > { %1483 = dma.done.wait (%p1599_p4), [#allocation6], 16  }
  0x31   : > { %1485 = vsyncadd (%p1599_p4), [#allocation6], 4294967280  ;;  %s228_s19 = sadd.s32 %s1488_s12, %s1492_s13  ;;  %p229_p5 = scmp.lt.s32.totalorder %s1496_s14, 1 }
  0x32   : > { %p231_p8 = scmp.lt.s32.totalorder %s228_s19, 25  ;;  %p241_p9 = scmp.lt.s32.totalorder %s1492_s13, 3 }
  0x33   : > { %s1819_s14 = smov (!%p229_p5, %s1496_s14), 1  ;;  %p1120_p4 = scmp.ne.s32.totalorder %s1488_s12, 0 }
  0x34   : > { %s1821_s19 = smov (!%p231_p8, %s228_s19), 25  ;;  %s1247_s24 = smul.u32 104, %s1819_s14 }
  0x35   : > { %s1116_s25 = sshll.u32 %s1821_s19, 2  ;;  %s1118_s30 = sshll.u32 %s1819_s14, 2 }
  0x36   : > { %s235_s26 = sadd.s32 %s1247_s24, %s1116_s25  ;;  %s1823_s13 = smov (!%p241_p9, %s1492_s13), 3 }
  0x37   : > { %s1117_s27 = sshll.u32 %s235_s26, 2  ;;  %s244_s4 = sadd.s32 %s1118_s30, %s1823_s13 }
  0x38   : > { %s237_s23 = scalar_lea.vmem %s1795_s0, %s1117_s27  ;;  %s1119_s5 = sshll.u32 %s244_s4, 2 }
  0x39   : > { %s1660_s8 = scalar_lea.vmem %s1798_s3, %s1119_s5  ;;  %251 = sbr.rel (%p1120_p4) target bundleno = 64 (0x40), region = 44 }
  0x3e   : > { %v1518_v0 = vmov 0.0  }
  0x3f   : > { %252 = vst [vmem:[#allocation2] sm:$0xf] %v1518_v0 }
  0x40 PF: > { %v1663_v1 = vld [vmem:[%s237_s23 + $0x8] sm:$0xf]  ;;  %v256_v2 = vld [vmem:[%s237_s23 + $0xc] sm:$0x1]  ;;  %v1668_v5 = vld [vmem:[%s237_s23] sm:$0xf] }
  0x41   : > { %v1125_v3 = vcombine.low %v1663_v1, %v1663_v1  ;;  %v1126_v4 = vcombine.low %v1663_v1, %v256_v2  ;;  %v254_v6 = vld [vmem:[%s237_s23 + $0x4] sm:$0xf]  ;;  %v1672_v7 = vcombine.low %v1668_v5, %v1668_v5  ;;  %s1519_s13 = smov 4   ;;  %s1180_s14 = smul.u32 384, %s1488_s12  ;;  %vm345_vm0 = vcmask 269312  }
  0x42   : > { %v1676_v14 = vcombine.low %v1668_v5, %v254_v6  ;;  %s1520_s9 = smov 99   ;;  %s1521_s10 = smov 33   ;;  %v1693_v40 = vcombine.low %v254_v6, %v254_v6  ;;  %v1698_v43 = vcombine.low %v254_v6, %v1663_v1  ;;  %vm349_vm1 = vcmask 539648  }
  0x43   : > { %v413_v8 = vrot.slane %v1125_v3, 2  ;;  %v397_v9 = vshrl.u32 %v1125_v3, 16  ;;  %v399_v10 = vshll.u32 %v1125_v3, 16  ;;  %v420_v11 = vshrl.u32 %v1126_v4, 16  ;;  %s1684_s11 = scalar_lea.vmem [#allocation3], %s1180_s14  ;;  %s1522_s19 = smov 66  }
  0x44   : > { %v423_v12 = vshll.u32 %v1126_v4, 16  ;;  %v261_v13 = vshrl.u32 %v1672_v7, 16  ;;  %v263_v18 = vshll.u32 %v1672_v7, 16  ;;  %v405_v23 = vrot.slane %v1125_v3, 1  ;;  %v1350_v29 = vld [vmem:[%s1684_s11 + $0x78] sm:$0xff]   ;;  %s1523_s24 = smov 37  }
  0x45   : > { %414 = vrot.lane.b32.xlu0 %v413_v8, %s1519_s13  ;;  %v408_v15 = vrot.slane %v397_v9, 1  ;;  %v409_v16 = vrot.slane %v399_v10, 2  ;;  %v401_v17 = vrot.slane %v399_v10, 1  ;;  %v422_v19 = vrot.slane %v420_v11, 2  ;;  %v1351_v30 = vld [vmem:[%s1684_s11 + $0x38] sm:$0xff]   ;;  %1181 = vmatprep.subr.bf16.mxu0 %v1350_v29  ;;  %v1352_v35 = vld [vmem:[%s1684_s11 + $0x70] sm:$0xff]  }
  0x46   : > { %v425_v20 = vrot.slane %v423_v12, 3  ;;  %v272_v24 = vrot.slane %v261_v13, 1  ;;  %v273_v26 = vrot.slane %v263_v18, 2  ;;  %v284_v27 = vshrl.u32 %v1676_v14, 16  ;;  %1182 = vmatpush3.bf16.msra.mxu0 %v1351_v30  ;;  %v1353_v36 = vld [vmem:[%s1684_s11 + $0xf8] sm:$0xff]   ;;  %s1524_s25 = smov 70  }
  0x47   : > { %v410_v21 = vor.u32 %v409_v16, %v408_v15  ;;  %v402_v22 = vor.u32 %v401_v17, %v397_v9  ;;  %v287_v28 = vshll.u32 %v1676_v14, 16  ;;  %v429_v31 = vrot.slane %v1126_v4, 3  ;;  %1183 = vmatprep.subr.bf16.mxu0 %v1352_v35  ;;  %1203 = vmatprep.subr.bf16.mxu1 %v1353_v36  ;;  %v1354_v41 = vld [vmem:[%s1684_s11 + $0x30] sm:$0xff]   ;;  %v1355_v44 = vld [vmem:[%s1684_s11 + $0xb8] sm:$0xff]   ;;  %v1356_v46 = vld [vmem:[%s1684_s11 + $0x68] sm:$0xff]   ;;  %s1525_s26 = smov 103  }
  0x48   : > { %v426_v25 = vor.u32 %v425_v20, %v422_v19  ;;  %v274_v32 = vor.u32 %v273_v26, %v272_v24  ;;  %v286_v33 = vrot.slane %v284_v27, 2  ;;  %v277_v37 = vrot.slane %v1672_v7, 2  ;;  %v1357_v51 = vld [vmem:[%s1684_s11 + $0xf0] sm:$0xff]   ;;  %1204 = vmatpush3.bf16.msra.mxu1 %v1355_v44  ;;  %v1358_v53 = vld [vmem:[%s1684_s11 + $0x28] sm:$0xff]   ;;  %v1360_v57 = vld [vmem:[%s1684_s11 + $0x60] sm:$0xff]   ;;  %s1526_s27 = smov 12  }
  0x49   : > { %411 = vrot.lane.b32.xlu0 %v410_v21, %s1520_s9  ;;  %403 = vrot.lane.b32.xlu1 %v402_v22, %s1521_s10  ;;  %v289_v34 = vrot.slane %v287_v28, 3  ;;  %v265_v39 = vrot.slane %v263_v18, 1  ;;  %v293_v42 = vrot.slane %v1676_v14, 3  ;;  %v296_v45 = vrot.slane %v284_v27, 3  ;;  %v1359_v55 = vld [vmem:[%s1684_s11 + $0xb0] sm:$0xff]   ;;  %v1361_v61 = vld [vmem:[%s1684_s11 + $0xe8] sm:$0xff]  }
  0x4a   : > { %1184 = vmatpush3.bf16.msra.mxu0 %v1354_v41  ;;  %v297_v48 = vrot.slane %v287_v28, 4  ;;  %v305_v49 = vshrl.u32 %v1693_v40, 16  ;;  %v307_v50 = vshll.u32 %v1693_v40, 16  ;;  %v269_v52 = vrot.slane %v1672_v7, 1  ;;  %1205 = vmatprep.subr.bf16.mxu1 %v1357_v51  ;;  %v1362_v62 = vld [vmem:[%s1684_s11 + $0x20] sm:$0xff]   ;;  %v1363_v63 = vld [vmem:[%s1684_s11 + $0xa8] sm:$0xff]  }
  0x4b   : > { %v290_v38 = vor.u32 %v289_v34, %v286_v33  ;;  %v266_v47 = vor.u32 %v265_v39, %v261_v13  ;;  %1185 = vmatprep.subr.bf16.mxu0 %v1356_v46  ;;  %v328_v54 = vshrl.u32 %v1698_v43, 16  ;;  %v331_v56 = vshll.u32 %v1698_v43, 16  ;;  %v1364_v6 = vld [vmem:[%s1684_s11 + $0x58] sm:$0xff]   ;;  %v1365_v7 = vld [vmem:[%s1684_s11 + $0xe0] sm:$0xff]   ;;  %s1527_s28 = smov 107   ;;  %v1368_v12 = vld [vmem:[%s1684_s11 + $0x50] sm:$0xff]  }
  0x4c   : > { %v298_v58 = vor.u32 %v297_v48, %v296_v45  ;;  %v316_v59 = vrot.slane %v305_v49, 1  ;;  %v317_v60 = vrot.slane %v307_v50, 2  ;;  %1206 = vmatpush3.bf16.msra.mxu1 %v1359_v55  ;;  %v321_v0 = vrot.slane %v1693_v40, 2  ;;  %v1366_v8 = vld [vmem:[%s1684_s11 + $0x18] sm:$0xff]   ;;  %v1367_v9 = vld [vmem:[%s1684_s11 + $0xa0] sm:$0xff]   ;;  %v1370_v14 = vld [vmem:[%s1684_s11 + $0x10] sm:$0xff]  }
  0x4d   : > { %406 = vrot.lane.b32.xlu0 %v405_v23, %s1522_s19  ;;  %427 = vrot.lane.b32.xlu1 %v426_v25, %s1523_s24  ;;  %v330_v3 = vrot.slane %v328_v54, 2  ;;  %v333_v4 = vrot.slane %v331_v56, 3  ;;  %v309_v11 = vrot.slane %v307_v50, 1  ;;  %v1369_v13 = vld [vmem:[%s1684_s11 + $0xd8] sm:$0xff]   ;;  %v337_v15 = vrot.slane %v1698_v43, 3  ;;  %s1528_s29 = smov 45  }
  0x4e   : > { %1186 = vmatpush3.bf16.msra.mxu0 %v1358_v53  ;;  %1207 = vmatprep.subr.bf16.mxu1 %v1361_v61  ;;  %v318_v2 = vor.u32 %v317_v60, %v316_v59  ;;  %v1371_v16 = vld [vmem:[%s1684_s11 + $0x98] sm:$0xff]   ;;  %s1529_s23 = smov 8   ;;  %v340_v18 = vrot.slane %v328_v54, 3  ;;  %v341_v19 = vrot.slane %v331_v56, 4  ;;  %v1372_v20 = vld [vmem:[%s1684_s11 + $0x48] sm:$0xff]   ;;  %v1373_v21 = vld [vmem:[%s1684_s11 + $0xd0] sm:$0xff]  }
  0x4f   : > { %1187 = vmatprep.subr.bf16.mxu0 %v1360_v57  ;;  %v334_v10 = vor.u32 %v333_v4, %v330_v3  ;;  %v310_v17 = vor.u32 %v309_v11, %v305_v49  ;;  %v1374_v22 = vld [vmem:[%s1684_s11 + $0x8] sm:$0xff]   ;;  %s1530_s30 = smov 78   ;;  %s1531_s4 = smov 41   ;;  %v313_v24 = vrot.slane %v1693_v40, 1  ;;  %v1375_v25 = vld [vmem:[%s1684_s11 + $0x90] sm:$0xff]   ;;  %v1376_v26 = vld [vmem:[%s1684_s11 + $0x40] sm:$0xff]  }
  0x50   : > { %1208 = vmatpush3.bf16.msra.mxu1 %v1363_v63  ;;  %v342_v23 = vor.u32 %v341_v19, %v340_v18  ;;  %v1377_v27 = vld [vmem:[%s1684_s11 + $0xc8] sm:$0xff]   ;;  %v1378_v28 = vld [vmem:[%s1684_s11] sm:$0xff]   ;;  %s1532_s5 = smov 111   ;;  %s1533_s6 = smov 74   ;;  %vm352_vm2 = vcmask 809984   ;;  %vm356_vm3 = vcmask 31744  }
  0x51   : > { %430 = vrot.lane.b32.xlu1 %v429_v31, %s1524_s25  ;;  %275 = vrot.lane.b32.xlu0 %v274_v32, %s1520_s9  ;;  %v1379_v29 = vld [vmem:[%s1684_s11 + $0x88] sm:$0xff]   ;;  %v1380_v30 = vld [vmem:[%s1684_s11 + $0xc0] sm:$0xff]   ;;  %vm359_vm4 = vcmask 302080   ;;  %vm362_vm5 = vcmask 572416   ;;  %s1534_s7 = smov 16   ;;  %vm365_vm6 = vcmask 842752  }
  0x52   : > { %1188 = vmatpush3.bf16.msra.mxu0 %v1362_v62  ;;  %1209 = vmatprep.subr.bf16.mxu1 %v1365_v7  ;;  %v1381_v31 = vld [vmem:[%s1684_s11 + $0x80] sm:$0xff]   ;;  %v1382_v32 = vld [vmem:[%s1684_s11 + $0x178] sm:$0xff]   ;;  %v1384_v59 = vld [vmem:[%s1684_s11 + $0x170] sm:$0xff]   ;;  %vm382_vm7 = vcmask 97280   ;;  %vm385_vm8 = vcmask 367616   ;;  %vm369_vm9 = vcmask 64512  }
  0x53   : > { %1189 = vmatprep.subr.bf16.mxu0 %v1364_v6  ;;  %v1383_v56 = vld [vmem:[%s1684_s11 + $0x138] sm:$0xff]   ;;  %v1385_v63 = vld [vmem:[%s1684_s11 + $0x130] sm:$0xff]   ;;  %v1387_v4 = vld [vmem:[%s1684_s11 + $0x128] sm:$0xff]   ;;  %vm388_vm10 = vcmask 637952   ;;  %vm372_vm11 = vcmask 334848   ;;  %vm375_vm12 = vcmask 605184  }
  0x54   : > { %1210 = vmatpush3.bf16.msra.mxu1 %v1367_v9  ;;  %v1388_v6 = vld [vmem:[%s1684_s11 + $0x160] sm:$0xff]   ;;  %vm391_vm13 = vcmask 908288   ;;  %vm378_vm14 = vcmask 875520   ;;  %vm453_vm15 = vcmask 130048   ;;  %p1176_p0 = scmp.ne.s32.totalorder %s1488_s12, 22 }
  0x55   : > { %278 = vrot.lane.b32.xlu1 %v277_v37, %s1519_s13  ;;  %291 = vrot.lane.b32.xlu0 %v290_v38, %s1523_s24  ;;  %v1389_v11 = vld [vmem:[%s1684_s11 + $0x120] sm:$0xff]  }
  0x56   : > { %1190 = vmatpush3.bf16.msra.mxu0 %v1366_v8  ;;  %1211 = vmatprep.subr.bf16.mxu1 %v1369_v13 }
  0x57   : > { %1191 = vmatprep.subr.bf16.mxu0 %v1368_v12  ;;  %v1390_v12 = vld [vmem:[%s1684_s11 + $0x158] sm:$0xff]  }
  0x58   : > { %1212 = vmatpush3.bf16.msra.mxu1 %v1371_v16 }
  0x59   : > { %294 = vrot.lane.b32.xlu0 %v293_v42, %s1524_s25  ;;  %267 = vrot.lane.b32.xlu1 %v266_v47, %s1521_s10 }
  0x5a   : > { %1192 = vmatpush3.bf16.msra.mxu0 %v1370_v14  ;;  %1213 = vmatprep.subr.bf16.mxu1 %v1373_v21 }
  0x5b   : > { %1193 = vmatprep.subr.bf16.mxu0 %v1372_v20  ;;  %v1392_v20 = vld [vmem:[%s1684_s11 + $0x150] sm:$0xff]  }
  0x5c   : > { %1214 = vmatpush3.bf16.msra.mxu1 %v1375_v25  ;;  %v1396_v25 = vld [vmem:[%s1684_s11 + $0x140] sm:$0xff]  }
  0x5d   : > { %299 = vrot.lane.b32.xlu0 %v298_v58, %s1525_s26  ;;  %270 = vrot.lane.b32.xlu1 %v269_v52, %s1522_s19 }
  0x5e   : > { %1194 = vmatpush3.bf16.msra.mxu0 %v1374_v22  ;;  %1215 = vmatprep.subr.bf16.mxu1 %v1377_v27  ;;  %v1393_v22 = vld [vmem:[%s1684_s11 + $0x110] sm:$0xff]  }
  0x5f   : > { %1195 = vmatprep.subr.bf16.mxu0 %v1376_v26  ;;  %v1397_v26 = vld [vmem:[%s1684_s11 + $0x100] sm:$0xff]  }
  0x60   : > { %1216 = vmatpush3.bf16.msra.mxu1 %v1379_v29 }
  0x61   : > { %322 = vrot.lane.b32.xlu0 %v321_v0, %s1526_s27  ;;  %319 = vrot.lane.b32.xlu1 %v318_v2, %s1527_s28 }
  0x62   : > { %1196 = vmatpush3.bf16.msra.mxu0 %v1378_v28  ;;  %1217 = vmatprep.subr.bf16.mxu1 %v1380_v30 }
  0x63   : > { %1225 = vmatprep.subr.bf16.mxu0 %v1382_v32 }
  0x64   : > { %1218 = vmatpush3.bf16.msra.mxu1 %v1381_v31 }
  0x65   : > { %335 = vrot.lane.b32.xlu0 %v334_v10, %s1528_s29  ;;  %302 = vrot.lane.b32.xlu1 %v1693_v40, %s1529_s23 }
  0x69   : > { %338 = vrot.lane.b32.xlu0 %v337_v15, %s1530_s30  ;;  %311 = vrot.lane.b32.xlu1 %v310_v17, %s1531_s4  ;;  %v1391_v17 = vld [vmem:[%s1684_s11 + $0x118] sm:$0xff]  }
  0x6d   : > { %343 = vrot.lane.b32.xlu0 %v342_v23, %s1532_s5  ;;  %314 = vrot.lane.b32.xlu1 %v313_v24, %s1533_s6  ;;  %v1394_v23 = vld [vmem:[%s1684_s11 + $0x148] sm:$0xff]  }
  0x6e   : > { %v1395_v24 = vld [vmem:[%s1684_s11 + $0x108] sm:$0xff]  }
  0xb7   : > { %v415_v33 = vpop.permute.xlu0 %414 }
  0xbb   : > { %v412_v34 = vpop.permute.xlu0 %411  ;;  %v404_v35 = vpop.permute.xlu1 %403 }
  0xbc   : > { %v434_v36 = vsel %vm345_vm0, %v1663_v1, %v404_v35  ;;  %v440_v41 = vsel %vm356_vm3, %v412_v34, %v415_v33 }
  0xbf   : > { %v407_v37 = vpop.permute.xlu0 %406  ;;  %v428_v38 = vpop.permute.xlu1 %427 }
  0xc0   : > { %v436_v39 = vsel %vm349_vm1, %v434_v36, %v407_v37  ;;  %v442_v42 = vsel %vm359_vm4, %v440_v41, %v428_v38 }
  0xc1   : > { %v438_v40 = vsel %vm352_vm2, %v436_v39, %v412_v34 }
  0xc2   : > { %449 = vrot.lane.b32.xlu1 %v438_v40, %s1534_s7 }
  0xc3   : > { %v431_v43 = vpop.permute.xlu1 %430  ;;  %v276_v44 = vpop.permute.xlu0 %275 }
  0xc4   : > { %v444_v1 = vsel %vm362_vm5, %v442_v42, %v431_v43 }
  0xc5   : > { %v446_v45 = vsel %vm365_vm6, %v444_v1, 0  ;;  %v460_v1 = vld [vmem:[#allocation2] sm:$0xf] }
  0xc6   : > { %451 = vrot.lane.b32.xlu0 %v446_v45, %s1534_s7 }
  0xc7   : > { %v279_v46 = vpop.permute.xlu1 %278  ;;  %v292_v47 = vpop.permute.xlu0 %291 }
  0xc8   : > { %v358_v48 = vsel %vm356_vm3, %v276_v44, %v279_v46 }
  0xc9   : > { %v361_v49 = vsel %vm359_vm4, %v358_v48, %v292_v47 }
  0xcb   : > { %v295_v50 = vpop.permute.xlu0 %294  ;;  %v268_v51 = vpop.permute.xlu1 %267 }
  0xcc   : > { %v364_v52 = vsel %vm362_vm5, %v361_v49, %v295_v50  ;;  %v348_v53 = vsel %vm345_vm0, %v1668_v5, %v268_v51  ;;  %v1386_v5 = vld [vmem:[%s1684_s11 + $0x168] sm:$0xff]  }
  0xcf   : > { %v300_v54 = vpop.permute.xlu0 %299  ;;  %v271_v55 = vpop.permute.xlu1 %270 }
  0xd0   : > { %v351_v57 = vsel %vm349_vm1, %v348_v53, %v271_v55  ;;  %v367_v58 = vsel %vm365_vm6, %v364_v52, %v300_v54 }
  0xd1   : > { %880 = vmatprep.mubr.bf16.mxu0 %v367_v58  ;;  %v354_v60 = vsel %vm352_vm2, %v351_v57, %v276_v44 }
  0xd2   : > { %881 = vmatmul.mubr.bf16.vlgmr.msra.gmra.mxu0 %v354_v60 }
  0xd3   : > { %v323_v61 = vpop.permute.xlu0 %322  ;;  %v320_v62 = vpop.permute.xlu1 %319  ;;  %1226 = vmatpush3.bf16.msra.mxu0 %v1383_v56 }
  0xd4   : > { %1227 = vmatprep.subr.bf16.mxu0 %v1384_v59  ;;  %v384_v0 = vsel %vm382_vm7, %v320_v62, %v323_v61 }
  0xd7   : > { %v336_v2 = vpop.permute.xlu0 %335  ;;  %v303_v3 = vpop.permute.xlu1 %302  ;;  %1228 = vmatpush3.bf16.msra.mxu0 %v1385_v63 }
  0xd8   : > { %1229 = vmatprep.subr.bf16.mxu0 %v1386_v5  ;;  %v387_v7 = vsel %vm385_vm8, %v384_v0, %v336_v2  ;;  %v371_v8 = vsel %vm369_vm9, %v300_v54, %v303_v3 }
  0xdb   : > { %v339_v9 = vpop.permute.xlu0 %338  ;;  %v312_v10 = vpop.permute.xlu1 %311  ;;  %1230 = vmatpush3.bf16.msra.mxu0 %v1387_v4 }
  0xdc   : > { %1231 = vmatprep.subr.bf16.mxu0 %v1388_v6  ;;  %v390_v13 = vsel %vm388_vm10, %v387_v7, %v339_v9  ;;  %v374_v14 = vsel %vm372_vm11, %v371_v8, %v312_v10 }
  0xdf   : > { %v344_v15 = vpop.permute.xlu0 %343  ;;  %v315_v16 = vpop.permute.xlu1 %314  ;;  %1232 = vmatpush3.bf16.msra.mxu0 %v1389_v11 }
  0xe0   : > { %v377_v18 = vsel %vm375_vm12, %v374_v14, %v315_v16  ;;  %v393_v19 = vsel %vm391_vm13, %v390_v13, %v344_v15  ;;  %1233 = vmatprep.subr.bf16.mxu0 %v1390_v12 }
  0xe1   : > { %920 = vmatprep.mubr.bf16.mxu1 %v393_v19  ;;  %v380_v21 = vsel %vm378_vm14, %v377_v18, %v320_v62 }
  0xe2   : > { %921 = vmatmul.mubr.bf16.vlgmr.msra.gmra.mxu1 %v380_v21 }
  0xe3   : > { %1234 = vmatpush3.bf16.msra.mxu0 %v1391_v17 }
  0xe4   : > { %1235 = vmatprep.subr.bf16.mxu0 %v1392_v20 }
  0xe7   : > { %1236 = vmatpush3.bf16.msra.mxu0 %v1393_v22 }
  0xe8   : > { %1237 = vmatprep.subr.bf16.mxu0 %v1394_v23 }
  0xeb   : > { %1238 = vmatpush3.bf16.msra.mxu0 %v1395_v24 }
  0xec   : > { %1239 = vmatprep.subr.bf16.mxu0 %v1396_v25 }
  0xef   : > { %1240 = vmatpush3.bf16.msra.mxu0 %v1397_v26 }
 0x134   : > { %v450_v27 = vpop.permute.xlu1 %449 }
 0x135   : > { %v458_v30 = vsel %vm453_vm15, %v344_v15, %v450_v27 }
 0x138   : > { %v452_v28 = vpop.permute.xlu0 %451 }
 0x139   : > { %v454_v29 = vsel %vm453_vm15, %v450_v27, %v452_v28 }
 0x13a   : > { %960 = vmatprep.mubr.bf16.mxu0 %v454_v29 }
 0x13b   : > { %961 = vmatmul.mubr.bf16.vlgmr.msra.gmra.mxu0 %v458_v30 }
 0x192   : > { %v1197_v31 = vpop.f32.mrf.mxu0 }
 0x194   : > { %v1198_v32 = vpop.f32.mrf.mxu0 }
 0x195   : > { %v1199_v33 = vadd.f32 %v1198_v32, %v1197_v31 }
 0x196   : > { %v1200_v34 = vpop.f32.mrf.mxu0 }
 0x198   : > { %v1201_v35 = vpop.f32.mrf.mxu0 }
 0x1a2   : > { %v1219_v36 = vpop.f32.mrf.mxu1 }
 0x1a4   : > { %v1220_v37 = vpop.f32.mrf.mxu1 }
 0x1a5   : > { %v1221_v38 = vadd.f32 %v1220_v37, %v1219_v36 }
 0x1a6   : > { %v1222_v39 = vpop.f32.mrf.mxu1 }
 0x1a7   : > { %v923_v40 = vadd.f32 %v1221_v38, %v1199_v33 }
 0x1a8   : > { %v1223_v41 = vpop.f32.mrf.mxu1 }
 0x1fb   : > { %v1241_v42 = vpop.f32.mrf.mxu0 }
 0x1fd   : > { %v1242_v43 = vpop.f32.mrf.mxu0 }
 0x1fe   : > { %v1243_v44 = vadd.f32 %v1242_v43, %v1241_v42 }
 0x1ff   : > { %v1244_v45 = vpop.f32.mrf.mxu0 }
 0x200   : > { %v963_v46 = vadd.f32 %v1243_v44, %v923_v40  ;;  %973 = sbr.rel (%p1176_p0) target bundleno = 530 (0x212), region = 48 }
 0x201   : > { %v1245_v47 = vpop.f32.mrf.mxu0 }
 0x202   : > { %v968_v48 = vadd.f32 %v963_v46, %v460_v1 }
 0x204   : > { %969 = vst [vmem:[#allocation2] sm:$0xf] %v968_v48 }
 0x205   : > { %v1177_v50 = vld [vmem:[#allocation5] ss:$0 sm:$0xff] }
 0x20b   : > { %v974_v49 = vld [vmem:[#allocation2] sm:$0xf] }
 0x20c   : > { %v982_v51 = vadd.f32 %v1177_v50, %v974_v49 }
 0x20e   : > { %vm983_vm0 = vcmp.gt.f32.partialorder %v982_v51, 0.0  ;;  %v984_v52 = vmul.f32 -0.2523705, %v982_v51 }
 0x210   : > { %v985_v53 = vsel %vm983_vm0, %v982_v51, %v984_v52 }
 0x211   : > { %986 = vst [vmem:[%s1660_s8] sm:$0xf] %v985_v53 }
 0x212 PF: > { %s15_s18 = sadd.s32 1, %s1512_s18   ;;  %s1802_s12 = smov %s1500_s15 }
 0x213   : > { %p12_p1 = scmp.ge.s32.totalorder %s15_s18, 186   ;;  %s1803_s13 = smov %s1504_s16 }
 0x214   : > { %s1804_s14 = smov %s1508_s17  ;;  %s1805_s15 = smov %s1809_s20 }
 0x215   : > { %s1806_s16 = smov %s1813_s21  ;;  %s1807_s17 = smov %s1817_s22 }
 0x216   :  { %14 = sbr.rel (!%p12_p1) target bundleno = 5 (0x5), region = 80 }
 0x21b   :  { %1014 = vsyncpa [#allocation4], 1 }
 0x21c   :  { %1016 = vsyncpa [#allocation4 + $0x1], 1 }
 0x21d   :  { %1017 = vsyncpa [#allocation6], 1 }

</bundles_post_ra>
